<compile_context>
chip_gen: v6e
topology: v6e:2x2x1
jax: 0.10.0
libtpu: 0.0.40
codegen_flags: <defaults>
</compile_context>

<pallas_src>
import jax
import jax.numpy as jnp
from jax.experimental import pallas as pl
from jax.experimental.pallas import tpu as pltpu


def _round_up(n: int, m: int) -> int:
    return ((n + m - 1) // m) * m


def _choose_tb(batch: int, block_b: int) -> int:
    """Batch tile: multiple of 8 sublanes; >= 2 tiles when batch allows (v7x)."""
    if batch <= 8:
        return 8
    n_tiles = max(2, -(-batch // block_b))       # ceil-div, but at least 2 tiles
    return _round_up(-(-batch // n_tiles), 8)


def _softq_kernel(x_ref, a_ref, w1x_ref, w1a_ref, b1_ref, w2_ref, b2_ref,
                  w3_ref, b3_ref, out_ref):
    # Activations come in the caller's dtype; MXU wants bf16.
    x = x_ref[...].astype(jnp.bfloat16)                     # [tb, num_obs]
    a = a_ref[...].astype(jnp.bfloat16)                     # [tb, num_act]

    n_crit = w2_ref.shape[0]                                # static (1 or 2)
    rows = []
    for c in range(n_crit):                                 # unrolled at trace time
        # fc1: two dots against the (obs, act) halves of w1 -> no concat needed.
        h1 = jnp.dot(x, w1x_ref[c], preferred_element_type=jnp.float32)
        h1 = h1 + jnp.dot(a, w1a_ref[c], preferred_element_type=jnp.float32)
        h1 = jnp.maximum(h1 + b1_ref[c], 0.0)               # [tb, H] f32 epilogue

        # fc2
        h2 = jnp.dot(h1.astype(jnp.bfloat16), w2_ref[c],
                     preferred_element_type=jnp.float32)
        h2 = jnp.maximum(h2 + b2_ref[c], 0.0)               # [tb, H] f32

        # fc3 (out_features == 1): lane-dense [1, tb] row straight off the MXU
        # (contract the hidden dim of w3 [1,H] with the hidden dim of h2 [tb,H]).
        q_row = jax.lax.dot_general(
            w3_ref[c], h2.astype(jnp.bfloat16),
            dimension_numbers=(((1,), (1,)), ((), ())),
            preferred_element_type=jnp.float32)             # [1, tb]
        rows.append(q_row + b3_ref[c])                      # scalar bias (SMEM)

    out_ref[...] = jnp.stack(rows, axis=1)                  # [1, C, tb]


def soft_q_forward(x, a, params, *, block_b: int = 1024):
    """x: [B, num_obs], a: [B, num_actions] -> q: [B, C] (float32).

    C is the number of fused critics carried by `params` (C=1 matches the
    PyTorch SoftQNetwork; C=2 fuses SAC's twin critics into one kernel call).
    """
    w1x, w1a, b1, w2, b2, w3, b3 = params
    n_crit, num_obs, hidden = w1x.shape
    num_act = w1a.shape[1]
    batch = x.shape[0]

    tb = _choose_tb(batch, block_b)
    b_pad = _round_up(batch, tb)
    if b_pad != batch:
        # Padded rows compute garbage that is sliced off below (tile chooser
        # keeps the padding to < 8 + tb/n_tiles rows).
        x = jnp.pad(x, ((0, b_pad - batch), (0, 0)))
        a = jnp.pad(a, ((0, b_pad - batch), (0, 0)))
    n_tiles = b_pad // tb

    const = lambda i: (0, 0, 0)   # weights/biases: VMEM-resident across steps
    act = lambda i: (i, 0)        # activations: tiled along batch
    outm = lambda i: (i, 0, 0)    # output: one lane-dense row block per step

    out = pl.pallas_call(
        _softq_kernel,
        out_shape=jax.ShapeDtypeStruct((n_tiles, n_crit, tb), jnp.float32),
        grid=(n_tiles,),
        in_specs=[
            pl.BlockSpec((tb, num_obs), act),                    # x
            pl.BlockSpec((tb, num_act), act),                    # a
            pl.BlockSpec((n_crit, num_obs, hidden), const),      # w1x (bf16)
            pl.BlockSpec((n_crit, num_act, hidden), const),      # w1a (bf16)
            pl.BlockSpec((n_crit, 1, hidden), const),            # b1  (f32)
            pl.BlockSpec((n_crit, hidden, hidden), const),       # w2  (bf16)
            pl.BlockSpec((n_crit, 1, hidden), const),            # b2  (f32)
            pl.BlockSpec((n_crit, 1, hidden), const),            # w3 rows (bf16)
            pl.BlockSpec(memory_space=pltpu.MemorySpace.SMEM),   # b3 scalars
        ],
        out_specs=pl.BlockSpec((1, n_crit, tb), outm),
        compiler_params=pltpu.CompilerParams(
            dimension_semantics=("parallel",),
            vmem_limit_bytes=32 * 1024 * 1024),
    )(x, a, w1x, w1a, b1, w2, b2, w3, b3)

    # (n_tiles, C, tb) -> (B, C), preserving batch order.
    q = jnp.transpose(out, (0, 2, 1)).reshape(b_pad, n_crit)
    return q[:batch]


def init_params(key, num_obs, num_actions, hidden=256, num_critics=1):
    """nn.Linear-style init U(-1/sqrt(fan_in), 1/sqrt(fan_in)).

    Returns (w1x, w1a, b1, w2, b2, w3_row, b3), each with a leading critic
    dim C = num_critics.  W stored [in, out]; matmul weights bf16, biases f32,
    b3 as a length-C f32 vector destined for SMEM.
    """
    def linear(k, fan_in, fan_out):
        kw, kb = jax.random.split(k)
        bound = 1.0 / (fan_in ** 0.5)
        w = jax.random.uniform(kw, (fan_in, fan_out), jnp.float32, -bound, bound)
        b = jax.random.uniform(kb, (1, fan_out), jnp.float32, -bound, bound)
        return w, b

    w1x_l, w1a_l, b1_l, w2_l, b2_l, w3_l, b3_l = ([] for _ in range(7))
    in_dim = num_obs + num_actions
    for kc in jax.random.split(key, num_critics):
        k1, k2, k3 = jax.random.split(kc, 3)
        w1, b1 = linear(k1, in_dim, hidden)
        w2, b2 = linear(k2, hidden, hidden)
        w3, b3 = linear(k3, hidden, 1)
        w1x_l.append(w1[:num_obs].astype(jnp.bfloat16))
        w1a_l.append(w1[num_obs:].astype(jnp.bfloat16))
        b1_l.append(b1)
        w2_l.append(w2.astype(jnp.bfloat16))
        b2_l.append(b2)
        w3_l.append(w3.T.astype(jnp.bfloat16))        # [1, hidden]
        b3_l.append(b3.reshape(()))                   # scalar
    return (jnp.stack(w1x_l), jnp.stack(w1a_l), jnp.stack(b1_l),
            jnp.stack(w2_l), jnp.stack(b2_l), jnp.stack(w3_l),
            jnp.stack(b3_l).astype(jnp.float32))


def reference_forward(x, a, params):
    """Pure-JAX reference mirroring the kernel math (bf16 weights, f32 acc)."""
    w1x, w1a, b1, w2, b2, w3, b3 = params
    xb = x.astype(jnp.bfloat16)
    ab = a.astype(jnp.bfloat16)
    qs = []
    for c in range(w1x.shape[0]):
        h1 = (jnp.dot(xb, w1x[c], preferred_element_type=jnp.float32)
              + jnp.dot(ab, w1a[c], preferred_element_type=jnp.float32) + b1[c])
        h1 = jnp.maximum(h1, 0.0)
        h2 = jnp.dot(h1.astype(jnp.bfloat16), w2[c],
                     preferred_element_type=jnp.float32) + b2[c]
        h2 = jnp.maximum(h2, 0.0)
        q = jnp.dot(h2.astype(jnp.bfloat16), w3[c].T,
                    preferred_element_type=jnp.float32) + b3[c]
        qs.append(q)                                   # [B, 1]
    return jnp.concatenate(qs, axis=1)


if __name__ == "__main__":
    # Small, module-consistent shapes: env.num_obs = 16, env.num_actions = 4.
    batch, num_obs, num_actions = 8, 16, 4

    key = jax.random.PRNGKey(0)
    kx, ka, kp1, kp2 = jax.random.split(key, 4)
    x = jax.random.normal(kx, (batch, num_obs), jnp.float32)
    a = jax.random.normal(ka, (batch, num_actions), jnp.float32)

    # Single critic -> matches the PyTorch SoftQNetwork forward ([B, 1]).
    params1 = init_params(kp1, num_obs, num_actions, hidden=256, num_critics=1)
    q1 = jax.block_until_ready(soft_q_forward(x, a, params1))
    q1_ref = reference_forward(x, a, params1)
    assert q1.shape == (batch, 1)
    assert jnp.allclose(q1, q1_ref, atol=1e-3, rtol=1e-3), (q1, q1_ref)

    # Fused twin critics (SAC qf1/qf2): one pallas_call, one x/a read ([B, 2]).
    params2 = init_params(kp2, num_obs, num_actions, hidden=256, num_critics=2)
    q2 = jax.block_until_ready(soft_q_forward(x, a, params2))
    q2_ref = reference_forward(x, a, params2)
    assert q2.shape == (batch, 2)
    assert jnp.allclose(q2, q2_ref, atol=1e-3, rtol=1e-3), (q2, q2_ref)

    print("KERNEL_OK")
</pallas_src>

<mosaic_0001>
module attributes {stable_mosaic.version = 11 : i64} {
  func.func @_softq_kernel(%arg0: i32, %arg1: memref<8x16xf32, #tpu.memory_space<vmem>>, %arg2: memref<8x4xf32, #tpu.memory_space<vmem>>, %arg3: memref<1x16x256xbf16, #tpu.memory_space<vmem>>, %arg4: memref<1x4x256xbf16, #tpu.memory_space<vmem>>, %arg5: memref<1x1x256xf32, #tpu.memory_space<vmem>>, %arg6: memref<1x256x256xbf16, #tpu.memory_space<vmem>>, %arg7: memref<1x1x256xf32, #tpu.memory_space<vmem>>, %arg8: memref<1x1x256xbf16, #tpu.memory_space<vmem>>, %arg9: memref<1xf32, #tpu.memory_space<smem>>, %arg10: memref<1x1x8xf32, #tpu.memory_space<vmem>>) attributes {dimension_semantics = [#tpu.dimension_semantics<parallel>], iteration_bounds = array<i64: 1>, scalar_prefetch = 0 : i64, scratch_operands = 0 : i64, tpu.core_type = #tpu.core_type<tc>, window_params = [{transform_indices = @transform_0, window_bounds = array<i64: 8, 16>}, {transform_indices = @transform_1, window_bounds = array<i64: 8, 4>}, {pipeline_mode = #tpu.pipeline_mode<synchronous>, transform_indices = @transform_2, window_bounds = array<i64: 1, 16, 256>}, {pipeline_mode = #tpu.pipeline_mode<synchronous>, transform_indices = @transform_3, window_bounds = array<i64: 1, 4, 256>}, {pipeline_mode = #tpu.pipeline_mode<synchronous>, transform_indices = @transform_4, window_bounds = array<i64: 1, 1, 256>}, {pipeline_mode = #tpu.pipeline_mode<synchronous>, transform_indices = @transform_5, window_bounds = array<i64: 1, 256, 256>}, {pipeline_mode = #tpu.pipeline_mode<synchronous>, transform_indices = @transform_6, window_bounds = array<i64: 1, 1, 256>}, {pipeline_mode = #tpu.pipeline_mode<synchronous>, transform_indices = @transform_7, window_bounds = array<i64: 1, 1, 256>}, {transform_indices = @transform_8, window_bounds = array<i64: 1>}, {transform_indices = @transform_9, window_bounds = array<i64: 1, 1, 8>}]} {
    %c0 = arith.constant 0 : index
    %c0_0 = arith.constant 0 : index
    %0 = vector.load %arg1[%c0, %c0_0] : memref<8x16xf32, #tpu.memory_space<vmem>>, vector<8x16xf32>
    %1 = arith.truncf %0 : vector<8x16xf32> to vector<8x16xbf16>
    %c0_1 = arith.constant 0 : index
    %c0_2 = arith.constant 0 : index
    %2 = vector.load %arg2[%c0_1, %c0_2] : memref<8x4xf32, #tpu.memory_space<vmem>>, vector<8x4xf32>
    %3 = arith.truncf %2 : vector<8x4xf32> to vector<8x4xbf16>
    %c0_3 = arith.constant 0 : index
    %c0_4 = arith.constant 0 : index
    %c0_5 = arith.constant 0 : index
    %4 = vector.load %arg3[%c0_3, %c0_4, %c0_5] : memref<1x16x256xbf16, #tpu.memory_space<vmem>>, vector<1x16x256xbf16>
    %5 = vector.shape_cast %4 : vector<1x16x256xbf16> to vector<16x256xbf16>
    %cst = arith.constant dense<0.000000e+00> : vector<8x256xf32>
    %6 = tpu.matmul %1, %5, %cst {dimension_numbers = #tpu.dot_dimension_numbers<[1], [0], [0], [1], [0, 0, 1, 1], [], []>} : vector<8x16xbf16>, vector<16x256xbf16>, vector<8x256xf32> -> vector<8x256xf32>
    %c0_6 = arith.constant 0 : index
    %c0_7 = arith.constant 0 : index
    %c0_8 = arith.constant 0 : index
    %7 = vector.load %arg4[%c0_6, %c0_7, %c0_8] : memref<1x4x256xbf16, #tpu.memory_space<vmem>>, vector<1x4x256xbf16>
    %8 = vector.shape_cast %7 : vector<1x4x256xbf16> to vector<4x256xbf16>
    %cst_9 = arith.constant dense<0.000000e+00> : vector<8x256xf32>
    %9 = tpu.matmul %3, %8, %cst_9 {dimension_numbers = #tpu.dot_dimension_numbers<[1], [0], [0], [1], [0, 0, 1, 1], [], []>} : vector<8x4xbf16>, vector<4x256xbf16>, vector<8x256xf32> -> vector<8x256xf32>
    %10 = arith.addf %6, %9 : vector<8x256xf32>
    %c0_10 = arith.constant 0 : index
    %c0_11 = arith.constant 0 : index
    %c0_12 = arith.constant 0 : index
    %11 = vector.load %arg5[%c0_10, %c0_11, %c0_12] : memref<1x1x256xf32, #tpu.memory_space<vmem>>, vector<1x1x256xf32>
    %12 = vector.shape_cast %11 : vector<1x1x256xf32> to vector<1x256xf32>
    %13 = vector.broadcast %12 : vector<1x256xf32> to vector<8x256xf32>
    %14 = arith.addf %10, %13 : vector<8x256xf32>
    %cst_13 = arith.constant 0.000000e+00 : f32
    %15 = vector.broadcast %cst_13 : f32 to vector<8x256xf32>
    %16 = arith.maximumf %14, %15 : vector<8x256xf32>
    %17 = arith.truncf %16 : vector<8x256xf32> to vector<8x256xbf16>
    %c0_14 = arith.constant 0 : index
    %c0_15 = arith.constant 0 : index
    %c0_16 = arith.constant 0 : index
    %18 = vector.load %arg6[%c0_14, %c0_15, %c0_16] : memref<1x256x256xbf16, #tpu.memory_space<vmem>>, vector<1x256x256xbf16>
    %19 = vector.shape_cast %18 : vector<1x256x256xbf16> to vector<256x256xbf16>
    %cst_17 = arith.constant dense<0.000000e+00> : vector<8x256xf32>
    %20 = tpu.matmul %17, %19, %cst_17 {dimension_numbers = #tpu.dot_dimension_numbers<[1], [0], [0], [1], [0, 0, 1, 1], [], []>} : vector<8x256xbf16>, vector<256x256xbf16>, vector<8x256xf32> -> vector<8x256xf32>
    %c0_18 = arith.constant 0 : index
    %c0_19 = arith.constant 0 : index
    %c0_20 = arith.constant 0 : index
    %21 = vector.load %arg7[%c0_18, %c0_19, %c0_20] : memref<1x1x256xf32, #tpu.memory_space<vmem>>, vector<1x1x256xf32>
    %22 = vector.shape_cast %21 : vector<1x1x256xf32> to vector<1x256xf32>
    %23 = vector.broadcast %22 : vector<1x256xf32> to vector<8x256xf32>
    %24 = arith.addf %20, %23 : vector<8x256xf32>
    %cst_21 = arith.constant 0.000000e+00 : f32
    %25 = vector.broadcast %cst_21 : f32 to vector<8x256xf32>
    %26 = arith.maximumf %24, %25 : vector<8x256xf32>
    %c0_22 = arith.constant 0 : index
    %c0_23 = arith.constant 0 : index
    %c0_24 = arith.constant 0 : index
    %27 = vector.load %arg8[%c0_22, %c0_23, %c0_24] : memref<1x1x256xbf16, #tpu.memory_space<vmem>>, vector<1x1x256xbf16>
    %28 = vector.shape_cast %27 : vector<1x1x256xbf16> to vector<1x256xbf16>
    %29 = arith.truncf %26 : vector<8x256xf32> to vector<8x256xbf16>
    %cst_25 = arith.constant dense<0.000000e+00> : vector<1x8xf32>
    %30 = tpu.matmul %28, %29, %cst_25 {dimension_numbers = #tpu.dot_dimension_numbers<[1], [1], [0], [0], [0, 0, 1, 0], [], []>} : vector<1x256xbf16>, vector<8x256xbf16>, vector<1x8xf32> -> vector<1x8xf32>
    %c0_26 = arith.constant 0 : index
    %31 = memref.load %arg9[%c0_26] : memref<1xf32, #tpu.memory_space<smem>>
    %32 = vector.broadcast %31 : f32 to vector<1x8xf32>
    %33 = arith.addf %30, %32 : vector<1x8xf32>
    %34 = vector.shape_cast %33 : vector<1x8xf32> to vector<1x1x8xf32>
    %c0_27 = arith.constant 0 : index
    %c0_28 = arith.constant 0 : index
    %c0_29 = arith.constant 0 : index
    %35 = vector.load %arg10[%c0_27, %c0_28, %c0_29] : memref<1x1x8xf32, #tpu.memory_space<vmem>>, vector<1x1x8xf32>
    tpu.vector_store %arg10[%c0_27, %c0_28, %c0_29], %34 {strides = array<i32>} : memref<1x1x8xf32, #tpu.memory_space<vmem>>, vector<1x1x8xf32>,
    return
  }
  func.func @transform_0(%arg0: i32) -> (i32, i32) {
    %c0_i32 = arith.constant 0 : i32
    %c0_i32_0 = arith.constant 0 : i32
    return %arg0, %c0_i32 : i32, i32
  }
  func.func @transform_1(%arg0: i32) -> (i32, i32) {
    %c0_i32 = arith.constant 0 : i32
    %c0_i32_0 = arith.constant 0 : i32
    return %arg0, %c0_i32 : i32, i32
  }
  func.func @transform_2(%arg0: i32) -> (i32, i32, i32) {
    %c0_i32 = arith.constant 0 : i32
    %c0_i32_0 = arith.constant 0 : i32
    %c0_i32_1 = arith.constant 0 : i32
    %c0_i32_2 = arith.constant 0 : i32
    return %c0_i32, %c0_i32_0, %c0_i32_1 : i32, i32, i32
  }
  func.func @transform_3(%arg0: i32) -> (i32, i32, i32) {
    %c0_i32 = arith.constant 0 : i32
    %c0_i32_0 = arith.constant 0 : i32
    %c0_i32_1 = arith.constant 0 : i32
    %c0_i32_2 = arith.constant 0 : i32
    return %c0_i32, %c0_i32_0, %c0_i32_1 : i32, i32, i32
  }
  func.func @transform_4(%arg0: i32) -> (i32, i32, i32) {
    %c0_i32 = arith.constant 0 : i32
    %c0_i32_0 = arith.constant 0 : i32
    %c0_i32_1 = arith.constant 0 : i32
    %c0_i32_2 = arith.constant 0 : i32
    return %c0_i32, %c0_i32_0, %c0_i32_1 : i32, i32, i32
  }
  func.func @transform_5(%arg0: i32) -> (i32, i32, i32) {
    %c0_i32 = arith.constant 0 : i32
    %c0_i32_0 = arith.constant 0 : i32
    %c0_i32_1 = arith.constant 0 : i32
    %c0_i32_2 = arith.constant 0 : i32
    return %c0_i32, %c0_i32_0, %c0_i32_1 : i32, i32, i32
  }
  func.func @transform_6(%arg0: i32) -> (i32, i32, i32) {
    %c0_i32 = arith.constant 0 : i32
    %c0_i32_0 = arith.constant 0 : i32
    %c0_i32_1 = arith.constant 0 : i32
    %c0_i32_2 = arith.constant 0 : i32
    return %c0_i32, %c0_i32_0, %c0_i32_1 : i32, i32, i32
  }
  func.func @transform_7(%arg0: i32) -> (i32, i32, i32) {
    %c0_i32 = arith.constant 0 : i32
    %c0_i32_0 = arith.constant 0 : i32
    %c0_i32_1 = arith.constant 0 : i32
    %c0_i32_2 = arith.constant 0 : i32
    return %c0_i32, %c0_i32_0, %c0_i32_1 : i32, i32, i32
  }
  func.func @transform_8(%arg0: i32) -> i32 {
    %c0_i32 = arith.constant 0 : i32
    %c0_i32_0 = arith.constant 0 : i32
    return %c0_i32 : i32
  }
  func.func @transform_9(%arg0: i32) -> (i32, i32, i32) {
    %c0_i32 = arith.constant 0 : i32
    %c0_i32_0 = arith.constant 0 : i32
    %c0_i32_1 = arith.constant 0 : i32
    return %arg0, %c0_i32, %c0_i32_0 : i32, i32, i32
  }
}

</mosaic_0001>

<bundles_post_ra>
// kernel: tpu_custom_call.1
= control target key start
LH: loop header
LB: loop body
LE: loop exit
PB: predicated region body
PF: predicated region fallthrough
CT: control target
= control target key end

     0   :  { %15 = vsyncpa [#allocation4], 0  ;;  %s823_s0 = inlined_call_operand.hbm [shape: f32[8,16], index: 0, kind: input, shape index: {}]   ;;  %s824_s1 = inlined_call_operand.vmem [shape: f32[8,4], index: 1, kind: input, shape index: {}]   ;;  %s825_s2 = inlined_call_operand.vmem [shape: bf16[1,16,256], index: 2, kind: input, shape index: {}]   ;;  %s826_s3 = inlined_call_operand.hbm [shape: bf16[1,4,256], index: 3, kind: input, shape index: {}]   ;;  %s827_s4 = inlined_call_operand.vmem [shape: f32[1,1,256], index: 4, kind: input, shape index: {}]   ;;  %s828_s5 = inlined_call_operand.hbm [shape: bf16[1,256,256], index: 5, kind: input, shape index: {}]   ;;  %s829_s6 = inlined_call_operand.vmem [shape: f32[1,1,256], index: 6, kind: input, shape index: {}]   ;;  %s830_s7 = inlined_call_operand.vmem [shape: bf16[1,1,256], index: 7, kind: input, shape index: {}]   ;;  %s831_s8 = inlined_call_operand.<no memory space> [shape: f32[1], index: 8, kind: input, shape index: {}]   ;;  %s832_s9 = inlined_call_operand.hbm [shape: f32[1,1,8], index: 9, kind: output, shape index: {}]  }
   0x1   :  { %16 = vsyncpa [#allocation7], 0 }
   0x2   :  { %17 = vsyncpa [#allocation5], 0  ;;  %s732_s30 = smov [#allocation6]   ;;  %s733_s11 = smov [#allocation3]  }
   0x3   :  { %s38_s10 = sshll.u32 %s732_s30, 4  ;;  %s24_s12 = sshll.u32 %s733_s11, 4  ;;  %s39_s10 = int_to_ptr.vmem [resolvable:$true] %s38_s10  ;;  %s25_s12 = int_to_ptr.vmem [resolvable:$true] %s24_s12 }
   0x4   :  { %s654_s13 = scalar_lea.vmem %s39_s10, 64  ;;  %p659_p1 = scmp.lt.s32.totalorder %s39_s10, %s39_s10 }
   0x5   :  { %p655_p0 = scmp.ne.s32.totalorder %s39_s10, %s654_s13  ;;  %p660_p2 = scmp.lt.s32.totalorder %s654_s13, %s654_s13 }
   0x7   :  { %p661_p3 = por %p660_p2, %p659_p1 }
   0x9   :  { %p662_p4 = pnand %p661_p3, %p655_p0 }
   0xb   :  { %665 = shalt.err (!%p662_p4)
}
   0xc   :  { %41 = dma.hbm_to_vmem [thread:$0]  %s826_s3, 64, %s39_s10, [#allocation7]  }
   0xd   :  { %s674_s16 = scalar_lea.vmem %s25_s12, 128  ;;  %p679_p6 = scmp.lt.s32.totalorder %s25_s12, %s25_s12 }
   0xe   :  { %p675_p5 = scmp.ne.s32.totalorder %s25_s12, %s674_s16  ;;  %p680_p7 = scmp.lt.s32.totalorder %s674_s16, %s674_s16 }
  0x10   :  { %p681_p8 = por %p680_p7, %p679_p6 }
  0x12   :  { %p682_p9 = pnand %p681_p8, %p675_p5 }
  0x14   :  { %685 = shalt.err (!%p682_p9)
}
  0x15   :  { %27 = dma.hbm_to_vmem [thread:$0]  %s823_s0, 128, %s25_s12, [#allocation4]  }
  0x16   :  { %s734_s19 = smov [#allocation8]  }
  0x17   :  { %s49_s20 = sshll.u32 %s734_s19, 4  ;;  %s50_s20 = int_to_ptr.vmem [resolvable:$true] %s49_s20 }
  0x18   :  { %s694_s21 = scalar_lea.vmem %s50_s20, 4096  ;;  %p699_p11 = scmp.lt.s32.totalorder %s50_s20, %s50_s20 }
  0x19   :  { %p695_p10 = scmp.ne.s32.totalorder %s50_s20, %s694_s21  ;;  %p700_p12 = scmp.lt.s32.totalorder %s694_s21, %s694_s21 }
  0x1b   :  { %p701_p13 = por %p700_p12, %p699_p11 }
  0x1d   :  { %p702_p0 = pnand %p701_p13, %p695_p10 }
  0x1f   :  { %705 = shalt.err (!%p702_p0)
}
  0x20   :  { %s735_s3 = smov 128   ;;  %s736_s22 = smov 8  }
  0x21   :  { %55 = dma.hbm_to_vmem [thread:$0]  %s828_s5, 4096, %s50_s20, [#allocation7], %s735_s3, %s735_s3, %s736_s22  }
  0x22   :  { %726 = dma.done.wait [#allocation4], 128  }
  0x23   :  { %727 = vsyncadd [#allocation4], 4294967168 }
  0x24   :  { %728 = dma.done.wait [#allocation7], 4160  }
  0x25   :  { %729 = vsyncadd [#allocation7], 4294963136  ;;  %v737_v0 = vmov 0   ;;  %vm92_vm0 = vcmask 1041408   ;;  %v74_v2 = vld [vmem:[%s824_s1] sm:$0xff]  ;;  %vm88_vm1 = vcmask 31744   ;;  %v197_v42 = vlaneseq }
  0x26   :  { %131 = vmatprep.mubr.bf16.mxu1 %v737_v0  ;;  %v548_v1 = vld.sshfl [vmem:[#allocation6] sm:$0x33 pattern:$0x76325410]  ;;  %v597_v5 = vld [vmem:[%s825_s2 + $0x4] ss:$8 sps:$4 sm:$0xff]   ;;  %v75_v6 = vpack.c.bf16 %v74_v2, %v74_v2 }
  0x27   :  { %v87_v3 = vcombine.high %v548_v1, %v548_v1  ;;  %v94_v4 = vsel %vm92_vm0, %v548_v1, 0  ;;  %v598_v7 = vld [vmem:[#allocation8 + $0x74] ss:$8 sps:$4 sm:$0xff]   ;;  %v600_v8 = vld [vmem:[#allocation8 + $0x70] ss:$8 sps:$4 sm:$0xff]   ;;  %vm150_vm2 = vcmask 130048  }
  0x28   :  { %v595_v9 = vld [vmem:[%s825_s2] ss:$8 sps:$4 sm:$0xff]   ;;  %v601_v10 = vld [vmem:[#allocation8 + $0x64] ss:$8 sps:$4 sm:$0xff]   ;;  %417 = vmatprep.subr.bf16.mxu0 %v598_v7  ;;  %v603_v11 = vld [vmem:[#allocation8 + $0x60] ss:$8 sps:$4 sm:$0xff]  }
  0x29   :  { %549 = vmatprep.subr.msk.bf16.mxu1 %vm92_vm0, %v87_v3  ;;  %418 = vmatpush1.bf16.msra.mxu0 %v600_v8  ;;  %v604_v12 = vld [vmem:[#allocation8 + $0x54] ss:$8 sps:$4 sm:$0xff]   ;;  %v606_v14 = vld [vmem:[#allocation8 + $0x50] ss:$8 sps:$4 sm:$0xff]   ;;  %v607_v16 = vld [vmem:[#allocation8 + $0x44] ss:$8 sps:$4 sm:$0xff]  }
  0x2a   :  { %114 = vmatpush1.bf16.msra.mxu1 %v94_v4  ;;  %419 = vmatprep.subr.bf16.mxu0 %v601_v10  ;;  %v72_v13 = vld [vmem:[#allocation3] sm:$0xff]  ;;  %v609_v17 = vld [vmem:[#allocation8 + $0x40] ss:$8 sps:$4 sm:$0xff]   ;;  %v613_v20 = vld [vmem:[#allocation8 + $0x24] ss:$8 sps:$4 sm:$0xff]   ;;  %v198_v43 = vshrl.u32 %v197_v42, 7 }
  0x2b   :  { %168 = vmatprep.subr.bf16.mxu1 %v597_v5  ;;  %v73_v15 = vpack.c.bf16 %v72_v13, %v72_v13  ;;  %v610_v18 = vld [vmem:[#allocation8 + $0x34] ss:$8 sps:$4 sm:$0xff]   ;;  %v612_v19 = vld [vmem:[#allocation8 + $0x30] ss:$8 sps:$4 sm:$0xff]   ;;  %v615_v21 = vld [vmem:[#allocation8 + $0x20] ss:$8 sps:$4 sm:$0xff]  }
  0x2c   :  { %v616_v22 = vld [vmem:[#allocation8 + $0x14] ss:$8 sps:$4 sm:$0xff]   ;;  %v618_v23 = vld [vmem:[#allocation8 + $0x10] ss:$8 sps:$4 sm:$0xff]   ;;  %v619_v24 = vld [vmem:[#allocation8 + $0x4] ss:$8 sps:$4 sm:$0xff]  }
  0x2d   :  { %550 = vmatmul.mubr.msk.bf16.vlgmr.msra.gmra.mxu1 %vm88_vm1, %v75_v6  ;;  %420 = vmatpush1.bf16.msra.mxu0 %v603_v11  ;;  %v621_v25 = vld [vmem:[#allocation8] ss:$8 sps:$4 sm:$0xff]   ;;  %v622_v26 = vld [vmem:[#allocation8 + $0xf4] ss:$8 sps:$4 sm:$0xff]   ;;  %v624_v27 = vld [vmem:[#allocation8 + $0xf0] ss:$8 sps:$4 sm:$0xff]  }
  0x2e   :  { %169 = vmatpush1.bf16.msra.mxu1 %v595_v9  ;;  %186 = vmatprep.mubr.bf16.mxu1 %v737_v0  ;;  %v625_v28 = vld [vmem:[#allocation8 + $0xe4] ss:$8 sps:$4 sm:$0xff]   ;;  %v627_v29 = vld [vmem:[#allocation8 + $0xe0] ss:$8 sps:$4 sm:$0xff]   ;;  %v628_v30 = vld [vmem:[#allocation8 + $0xd4] ss:$8 sps:$4 sm:$0xff]  }
  0x2f   :  { %421 = vmatprep.subr.bf16.mxu0 %v604_v12  ;;  %v630_v31 = vld [vmem:[#allocation8 + $0xd0] ss:$8 sps:$4 sm:$0xff]   ;;  %v631_v32 = vld [vmem:[#allocation8 + $0xc4] ss:$8 sps:$4 sm:$0xff]   ;;  %v633_v33 = vld [vmem:[#allocation8 + $0xc0] ss:$8 sps:$4 sm:$0xff]  }
  0x30   :  { %v634_v34 = vld [vmem:[#allocation8 + $0xb4] ss:$8 sps:$4 sm:$0xff]   ;;  %v636_v35 = vld [vmem:[#allocation8 + $0xb0] ss:$8 sps:$4 sm:$0xff]   ;;  %v637_v36 = vld [vmem:[#allocation8 + $0xa4] ss:$8 sps:$4 sm:$0xff]  }
  0x31   :  { %422 = vmatpush1.bf16.msra.mxu0 %v606_v14  ;;  %v639_v37 = vld [vmem:[#allocation8 + $0xa0] ss:$8 sps:$4 sm:$0xff]   ;;  %v640_v38 = vld [vmem:[#allocation8 + $0x94] ss:$8 sps:$4 sm:$0xff]   ;;  %v642_v39 = vld [vmem:[#allocation8 + $0x90] ss:$8 sps:$4 sm:$0xff]  }
  0x32   :  { %423 = vmatprep.subr.bf16.mxu0 %v607_v16  ;;  %v643_v40 = vld [vmem:[#allocation8 + $0x84] ss:$8 sps:$4 sm:$0xff]   ;;  %v645_v41 = vld [vmem:[#allocation8 + $0x80] ss:$8 sps:$4 sm:$0xff]   ;;  %v199_v46 = vsub.s32 0, %v198_v43  ;;  %v203_v49 = vsub.s32 1, %v198_v43 }
  0x33   :  { %v195_v48 = vld [vmem:[%s827_s4] sm:$0x3]  ;;  %v738_v1 = vmov 1966171168   ;;  %vm530_vm3 = vcmask 57344  }
  0x34   :  { %v200_v51 = vrot.slane %v195_v48, %v199_v46  ;;  %v204_v54 = vrot.slane %v195_v48, %v203_v49  ;;  %v475_v2 = vunpack.c.l.s4 %v738_v1  ;;  %v586_v3 = vld.sshfl [vmem:[%s830_s7] sm:$0x11 pattern:$0x75316420] }
  0x35   :  { %553 = vmatmul.mubr.msk.bf16.vlgmr.msra.gmra.mxu1 %vm150_vm2, %v73_v15  ;;  %424 = vmatpush1.bf16.msra.mxu0 %v609_v17  ;;  %v473_v5 = vcombine.high %v586_v3, %v586_v3  ;;  %v245_v9 = vld [vmem:[%s829_s6] sm:$0x3]  ;;  %s739_s6 = smov [#allocation9]  }
  0x36   :  { %425 = vmatprep.subr.bf16.mxu0 %v610_v18  ;;  %v476_v4 = vunpack.c.0.s8 %v475_v2  ;;  %v250_v10 = vrot.slane %v245_v9, %v199_v46  ;;  %v254_v11 = vrot.slane %v245_v9, %v203_v49  ;;  %s538_s12 = sshll.u32 %s739_s6, 4  ;;  %s539_s12 = int_to_ptr.vmem [resolvable:$true] %s538_s12 }
  0x37   :  { %s706_s13 = scalar_lea.vmem %s539_s12, 16  ;;  %s710_s14 = scalar_lea.vmem %s539_s12, 32 }
  0x38   :  { %v479_v6 = vsub.s32 %v476_v4, %v198_v43  ;;  %p707_p1 = scmp.ne.s32.totalorder %s539_s12, %s706_s13  ;;  %p711_p2 = scmp.lt.s32.totalorder %s539_s12, %s539_s12 }
  0x39   :  { %426 = vmatpush1.bf16.msra.mxu0 %v612_v19  ;;  %p712_p3 = scmp.lt.s32.totalorder %s710_s14, %s706_s13 }
  0x3a   :  { %427 = vmatprep.subr.bf16.mxu0 %v613_v20  ;;  %v487_v7 = vrot.slane %v473_v5, %v479_v6  ;;  %v480_v8 = vrot.slane %v586_v3, %v479_v6 }
  0x3b   :  { %p713_p4 = por %p712_p3, %p711_p2 }
  0x3c   :  { %522 = vmatprep.mubr.bf16.mxu1 %v487_v7 }
  0x3d   :  { %428 = vmatpush1.bf16.msra.mxu0 %v615_v21  ;;  %p714_p5 = pnand %p713_p4, %p707_p1 }
  0x3e   :  { %429 = vmatprep.subr.bf16.mxu0 %v616_v22  ;;  %v464_v22 = vstv %s831_s8 }
  0x41   :  { %430 = vmatpush1.bf16.msra.mxu0 %v618_v23 }
  0x42   :  { %431 = vmatprep.subr.bf16.mxu0 %v619_v24 }
  0x45   :  { %432 = vmatpush1.bf16.msra.mxu0 %v621_v25 }
  0x46   :  { %433 = vmatprep.subr.bf16.mxu0 %v622_v26 }
  0x49   :  { %434 = vmatpush2.bf16.msra.mxu0 %v624_v27 }
  0x4a   :  { %435 = vmatprep.subr.bf16.mxu0 %v625_v28 }
  0x4d   :  { %436 = vmatpush2.bf16.msra.mxu0 %v627_v29 }
  0x4e   :  { %437 = vmatprep.subr.bf16.mxu0 %v628_v30 }
  0x51   :  { %438 = vmatpush2.bf16.msra.mxu0 %v630_v31 }
  0x52   :  { %439 = vmatprep.subr.bf16.mxu0 %v631_v32 }
  0x55   :  { %440 = vmatpush2.bf16.msra.mxu0 %v633_v33 }
  0x56   :  { %441 = vmatprep.subr.bf16.mxu0 %v634_v34 }
  0x59   :  { %442 = vmatpush2.bf16.msra.mxu0 %v636_v35 }
  0x5a   :  { %443 = vmatprep.subr.bf16.mxu0 %v637_v36 }
  0x5d   :  { %444 = vmatpush2.bf16.msra.mxu0 %v639_v37 }
  0x5e   :  { %445 = vmatprep.subr.bf16.mxu0 %v640_v38 }
  0x61   :  { %446 = vmatpush2.bf16.msra.mxu0 %v642_v39 }
  0x62   :  { %447 = vmatprep.subr.bf16.mxu0 %v643_v40 }
  0x65   :  { %448 = vmatpush2.bf16.msra.mxu0 %v645_v41 }
  0xed   :  { %v133_v44 = vpop.f32.mrf.mxu1 }
  0xef   :  { %v135_v45 = vpop.f32.mrf.mxu1 }
  0xf1   :  { %v137_v47 = vpop.f32.mrf.mxu1 }
  0xf3   :  { %v138_v50 = vpop.f32.mrf.mxu1 }
  0xf5   :  { %v188_v52 = vpop.f32.mrf.mxu1 }
  0xf6   :  { %v189_v53 = vadd.f32 %v188_v52, %v133_v44 }
  0xf7   :  { %v190_v55 = vpop.f32.mrf.mxu1 }
  0xf8   :  { %v207_v56 = vadd.f32 %v200_v51, %v189_v53  ;;  %v191_v57 = vadd.f32 %v190_v55, %v135_v45 }
  0xf9   :  { %v192_v58 = vpop.f32.mrf.mxu1 }
  0xfa   :  { %v208_v59 = vadd.f32 %v204_v54, %v191_v57  ;;  %v209_v60 = vmax.f32 %v207_v56, 0.0 }
  0xfb   :  { %v193_v61 = vpop.f32.mrf.mxu1 }
  0xfc   :  { %v210_v62 = vmax.f32 %v208_v59, 0.0  ;;  %v211_v0 = vpack.c.bf16 %v209_v60, %v209_v60 }
  0xfe   :  { %v212_v63 = vpack.c.bf16 %v210_v62, %v210_v62 }
 0x100   :  { %449 = vmatprep.mubr.bf16.mxu0 %v212_v63 }
 0x101   :  { %450 = vmatmul.mubr.bf16.vlgmr.msra.gmra.mxu0 %v211_v0 }
 0x1c1   :  { %v451_v12 = vpop.f32.mrf.mxu0 }
 0x1c2   :  { %v452_v13 = vadd.f32 %v451_v12, %v250_v10 }
 0x1c3   :  { %v453_v14 = vpop.f32.mrf.mxu0 }
 0x1c4   :  { %v454_v15 = vadd.f32 %v453_v14, %v254_v11  ;;  %v458_v16 = vmax.f32 %v452_v13, 0.0 }
 0x1c5   :  { %v455_v17 = vpop.f32.mrf.mxu0 }
 0x1c6   :  { %v459_v18 = vmax.f32 %v454_v15, 0.0  ;;  %v461_v21 = vpack.c.bf16 %v458_v16, %v458_v16 }
 0x1c7   :  { %v456_v19 = vpop.f32.mrf.mxu0 }
 0x1c8   :  { %v462_v20 = vpack.c.bf16 %v459_v18, %v459_v18 }
 0x1ca   :  { %504 = vmatprep.subr.bf16.mxu1 %v462_v20 }
 0x1cb   :  { %505 = vmatpush1.bf16.xpose.msra.mxu1 %v461_v21 }
 0x1d2   :  { %523 = vmatmul.mubr.bf16.vlgmr.msra.gmra.mxu1 %v480_v8 }
 0x292   :  { %v524_v23 = vpop.f32.mrf.mxu1 }
 0x293   :  { %v525_v24 = vadd.f32 %v524_v23, %v464_v22 }
 0x294   :  { %v526_v25 = vpop.f32.mrf.mxu1 }
 0x295   :  { %531 = vst.msk [vmem:[#allocation9] sm:$0x1] %vm530_vm3, %v525_v24 }
 0x296   :  { %v527_v26 = vpop.f32.mrf.mxu1 }
 0x297   :  { %717 = shalt.err (!%p714_p5)
}
 0x298   :  { %541 = dma.vmem_to_hbm [thread:$0]  %s539_s12, 16, %s832_s9, [#allocation5]   ;;  %v528_v27 = vpop.f32.mrf.mxu1 }
 0x299   :  { %730 = dma.done.wait [#allocation5], 16  }
 0x29a   :  { %731 = vsyncadd [#allocation5], 4294967280 }
 0x29b   :  { %545 = vsyncpa [#allocation4], 1 }
 0x29c   :  { %546 = vsyncpa [#allocation7], 1 }
 0x29d   :  { %547 = vsyncpa [#allocation5], 1 }

</bundles_post_ra>
